<compile_context>
chip_gen: v7x
topology: tpu7x:2x2x1
jax: 0.10.0
libtpu: 0.0.40
codegen_flags: <defaults>
</compile_context>

<pallas_src>
import functools

import jax
import jax.numpy as jnp
from jax.experimental import pallas as pl
from jax.experimental.pallas import tpu as pltpu

# ----- model config (mirrors EmbeddingNet.__init__) -------------------------
DEFAULT_CHARS_LEN = 27          # len(DEFAULT_CHARS): 26 letters + terminator
EMBEDDING_SIZE = 8
CONTEXT_LENGTH = 4
LAYER_SIZES = [EMBEDDING_SIZE * CONTEXT_LENGTH, 64, DEFAULT_CHARS_LEN]
BIASES = True

_TILE_B_MAX = 4096              # v7x-safe cap (keeps per-step VMEM well under 32 MiB)


def _round_up(x, m):
    return ((x + m - 1) // m) * m


def _default_matmul_dtype():
    """bf16 operands on v6e/v7x; f32 on v5e (its VPU/EUP have no native bf16)."""
    try:
        kind = jax.devices()[0].device_kind.lower()
    except Exception:  # pragma: no cover - e.g. no devices during tracing tools
        return jnp.float32
    if "v5 lite" in kind or "v5e" in kind or "v5lite" in kind:
        return jnp.float32
    return jnp.bfloat16


# ----------------------------------------------------------------------------
# Kernel
# ----------------------------------------------------------------------------
def _embedding_net_kernel(context_length, x_ref, t_ref, out_ref):
    """x_ref: (TILE_B, C) int32 indices pre-offset by c*VP per context position.
    t_ref: (C*VP, V_OUT) fused (embedding @ all-linear-layers + bias) table.
    out_ref: (TILE_B, V_OUT) softmax probabilities (padded lanes ~0).
    """
    tile_b = x_ref.shape[0]
    k = t_ref.shape[0]                                   # C * VP (== 128 here)

    # Selection mask built in-kernel: bool OR of the per-position compares,
    # cast to the matmul dtype exactly once.
    x = x_ref[...]                                       # (TILE_B, C) int32
    lane = jax.lax.broadcasted_iota(jnp.int32, (tile_b, k), 1)
    hot = lane == x[:, 0:1]
    for c in range(1, context_length):
        hot = jnp.logical_or(hot, lane == x[:, c:c + 1])
    onehot = hot.astype(t_ref.dtype)

    # Entire network (gather + all linear layers + biases) = one MXU matmul.
    logits = jnp.dot(onehot, t_ref[...], preferred_element_type=jnp.float32)

    # Row-wise softmax over the lane-dense (padded) vocab axis, in f32.
    m = jnp.max(logits, axis=-1, keepdims=True)
    e = jnp.exp(logits - m)
    denom = jnp.sum(e, axis=-1, keepdims=True)
    out_ref[...] = (e * pl.reciprocal(denom, approx=True)).astype(out_ref.dtype)


# ----------------------------------------------------------------------------
# Parameter preparation (trace-time, tiny)
# ----------------------------------------------------------------------------
def _prepare_params(embedding, weights, biases, context_length, matmul_dtype):
    """Fold embedding + every linear layer + all biases into one fused table.

    Returns (table, vp, v_out) with table shape (context_length*vp, v_out):
      logits[b] = sum_c table[x[b,c] + c*vp]   (bias already folded into block 0).
    """
    V, E = embedding.shape
    L = len(weights)
    vp = _round_up(V, 32)          # per-context slot width (C*VP = 128 here)
    v_out = _round_up(V, 128)      # lane-dense output width

    emb = embedding.astype(jnp.float32)
    w0 = weights[0].astype(jnp.float32)

    # Fuse the embedding gather with layer 0: T_c = emb @ W0[c*E:(c+1)*E].
    parts = []
    for c in range(context_length):
        t_c = emb @ w0[c * E:(c + 1) * E, :]             # (V, H1)
        parts.append(jnp.pad(t_c, ((0, vp - V), (0, 0))))
    table = jnp.concatenate(parts, axis=0)               # (C*VP, H1) f32
    bias_total = biases[0].astype(jnp.float32).reshape(1, -1)

    # No nonlinearity between layers -> fold every remaining linear layer too.
    for i in range(1, L):
        w = weights[i].astype(jnp.float32)
        b = biases[i].astype(jnp.float32).reshape(1, -1)
        table = table @ w
        bias_total = bias_total @ w + b

    # Pad vocab axis to 128 lanes: zero weight columns + finite big-negative bias
    # so padded lanes get exp() == 0 (finite so it stays safe even in bf16).
    table = jnp.pad(table, ((0, 0), (0, v_out - V)))
    bias_total = jnp.pad(bias_total, ((0, 0), (0, v_out - V)), constant_values=-1e9)

    # Fold the total bias into context-block 0: exactly one lane of that block is
    # hot per example, so the bias is added exactly once during the matmul.
    table = table.at[:vp, :].add(bias_total)

    return table.astype(matmul_dtype), vp, v_out


# ----------------------------------------------------------------------------
# Wrapper
# ----------------------------------------------------------------------------
def embedding_net_forward(x_idx, embedding, weights, biases, *,
                          matmul_dtype=None, out_dtype=jnp.float32,
                          tile_b=2048, slice_output=True):
    """Pallas implementation of EmbeddingNet.forward.

    Args:
      x_idx:        (B, C) int32 indices into the vocab.
      embedding:    (V, E) float32 embedding table.
      weights:      list of (in, out) float32 weight matrices.
      biases:       list of (out,) float32 bias vectors.
      matmul_dtype: matmul operand dtype; None -> bf16 on v6e/v7x, f32 on v5e.
      out_dtype:    probability dtype written to HBM (bf16 halves writeback bytes).
      tile_b:       batch rows per grid step (clamped to a v7x-safe maximum).
      slice_output: True -> return (B, V); False -> return the padded
                    (B_pad, 128) block (lets XLA fuse the slice into consumers).

    Returns:
      (B, V) (or padded (B_pad, 128)) softmax probabilities.
    """
    if matmul_dtype is None:
        matmul_dtype = _default_matmul_dtype()

    B, C = x_idx.shape
    V, E = embedding.shape
    assert weights[0].shape[0] == C * E
    assert weights[-1].shape[1] == V
    assert len(weights) == len(biases)

    table, vp, v_out = _prepare_params(embedding, weights, biases, C, matmul_dtype)
    k = table.shape[0]

    # Pre-offset indices so context position c lights a lane in [c*VP, (c+1)*VP).
    x_off = x_idx.astype(jnp.int32) + (jnp.arange(C, dtype=jnp.int32) * vp)[None, :]

    # Batch tiling: clamp for VMEM headroom; if the whole batch fits in one tile,
    # split it so the grid has >= 2 parallel steps (keeps both v7x TCs busy).
    tile_b = max(8, min(int(tile_b), _TILE_B_MAX))
    b_pad8 = _round_up(B, 8)
    if tile_b >= b_pad8:
        tile_b = b_pad8 if b_pad8 < 16 else _round_up(b_pad8 // 2, 8)
    b_pad = _round_up(B, tile_b)
    if b_pad != B:
        x_off = jnp.pad(x_off, ((0, b_pad - B), (0, 0)))   # padded rows -> index 0
    grid = (b_pad // tile_b,)

    mm_sz = jnp.dtype(matmul_dtype).itemsize
    out_sz = jnp.dtype(out_dtype).itemsize

    # Explicit VMEM budget (index block is lane-padded to 128 lanes in VMEM).
    vmem_est = tile_b * (128 * 4 * 2            # index block, double-buffered
                         + v_out * out_sz * 2   # output block, double-buffered
                         + k * mm_sz            # one-hot mask
                         + v_out * 4 * 3)       # f32 logits / exp / scratch
    vmem_est += 4 * k * v_out * mm_sz           # fused table + headroom
    vmem_limit = int(min(max(vmem_est * 3 // 2, 32 << 20), 60 << 20))

    cost = pl.CostEstimate(
        flops=2 * b_pad * k * v_out,
        transcendentals=b_pad * v_out,
        bytes_accessed=b_pad * (C * 4 + v_out * out_sz) + k * v_out * mm_sz,
    )

    const_map = lambda i: (0, 0)
    in_specs = [pl.BlockSpec((tile_b, C), lambda i: (i, 0)),
                pl.BlockSpec((k, v_out), const_map)]
    out_spec = pl.BlockSpec((tile_b, v_out), lambda i: (i, 0))

    kernel = functools.partial(_embedding_net_kernel, C)

    out = pl.pallas_call(
        kernel,
        out_shape=jax.ShapeDtypeStruct((b_pad, v_out), out_dtype),
        grid=grid,
        in_specs=in_specs,
        out_specs=out_spec,
        compiler_params=pltpu.CompilerParams(
            dimension_semantics=("parallel",),      # batch sharded across TCs (v7x)
            vmem_limit_bytes=vmem_limit),
        cost_estimate=cost,
    )(x_off, table)

    if slice_output:
        return out[:B, :V]
    return out


# ----------------------------------------------------------------------------
# References
# ----------------------------------------------------------------------------
def _reference_forward(x_idx, embedding, weights, biases):
    """Plain-JAX f32 reference matching the PyTorch forward."""
    B, C = x_idx.shape
    V, E = embedding.shape
    x = embedding[x_idx].reshape(B, C * E)
    for w, b in zip(weights, biases):
        x = x @ w + b
    return jax.nn.softmax(x, axis=1)


def _matched_reference(x_idx, embedding, weights, biases, matmul_dtype):
    """Reference applying the identical trace-time fusion / quantisation."""
    B, C = x_idx.shape
    V, _ = embedding.shape
    table, vp, _ = _prepare_params(embedding, weights, biases, C, matmul_dtype)
    x_off = x_idx.astype(jnp.int32) + (jnp.arange(C, dtype=jnp.int32) * vp)[None, :]
    logits = jnp.sum(table.astype(jnp.float32)[x_off], axis=1)   # (B, v_out)
    return jax.nn.softmax(logits, axis=1)[:, :V]


if __name__ == "__main__":
    key = jax.random.PRNGKey(0)
    keys = jax.random.split(key, 3 + 2 * (len(LAYER_SIZES) - 1))
    k_emb, k_x, k_x2 = keys[0], keys[1], keys[2]
    k_params = keys[3:]

    # Deterministic synthetic parameters (shapes per EmbeddingNet.__init__).
    embedding = jax.random.normal(k_emb, (DEFAULT_CHARS_LEN, EMBEDDING_SIZE), jnp.float32)
    weights, biases = [], []
    for i in range(len(LAYER_SIZES) - 1):
        weights.append(jax.random.normal(
            k_params[2 * i], (LAYER_SIZES[i], LAYER_SIZES[i + 1]), jnp.float32))
        biases.append(jax.random.normal(
            k_params[2 * i + 1], (LAYER_SIZES[i + 1],), jnp.float32))

    # (1) Small batch, f32 matmuls, vs. plain PyTorch-semantics reference.
    #     Also exercises batch padding (10 -> 16) and the >=2-step grid split.
    B = 10
    x_idx = jax.random.randint(k_x, (B, CONTEXT_LENGTH), 0, DEFAULT_CHARS_LEN, jnp.int32)
    ref = _reference_forward(x_idx, embedding, weights, biases)
    probs_f32 = jax.block_until_ready(
        embedding_net_forward(x_idx, embedding, weights, biases,
                              matmul_dtype=jnp.float32))
    assert probs_f32.shape == (B, DEFAULT_CHARS_LEN)
    assert jnp.allclose(probs_f32, ref, atol=5e-3, rtol=5e-3)
    assert jnp.allclose(jnp.sum(probs_f32, axis=1), 1.0, atol=5e-3)

    # (2) Auto matmul dtype (bf16 on v6e/v7x, f32 on v5e) vs. a reference with
    #     identical fusion/quantisation.
    auto_dtype = _default_matmul_dtype()
    probs_auto = jax.block_until_ready(
        embedding_net_forward(x_idx, embedding, weights, biases))
    ref_auto = _matched_reference(x_idx, embedding, weights, biases, auto_dtype)
    assert probs_auto.shape == (B, DEFAULT_CHARS_LEN)
    assert jnp.allclose(probs_auto, ref_auto, atol=5e-3, rtol=5e-3)
    assert jnp.allclose(jnp.sum(probs_auto, axis=1), 1.0, atol=5e-3)

    # (3) Multi-step batch grid (default big tile, pipelining + parallel axis).
    B2 = 3000
    x_idx2 = jax.random.randint(k_x2, (B2, CONTEXT_LENGTH), 0, DEFAULT_CHARS_LEN, jnp.int32)
    probs2 = jax.block_until_ready(
        embedding_net_forward(x_idx2, embedding, weights, biases,
                              matmul_dtype=jnp.float32, tile_b=1024))
    ref2 = _reference_forward(x_idx2, embedding, weights, biases)
    assert probs2.shape == (B2, DEFAULT_CHARS_LEN)
    assert jnp.allclose(probs2, ref2, atol=5e-3, rtol=5e-3)

    # (4) bf16 probability writeback (half the output HBM bytes).
    probs_bf16out = jax.block_until_ready(
        embedding_net_forward(x_idx, embedding, weights, biases,
                              matmul_dtype=jnp.float32, out_dtype=jnp.bfloat16))
    assert probs_bf16out.shape == (B, DEFAULT_CHARS_LEN)
    assert jnp.allclose(probs_bf16out.astype(jnp.float32), ref, atol=1.5e-2, rtol=1.5e-2)
    assert jnp.allclose(jnp.sum(probs_bf16out.astype(jnp.float32), axis=1), 1.0, atol=2e-2)

    print("KERNEL_OK")
</pallas_src>

<mosaic_0001>
module attributes {stable_mosaic.version = 11 : i64} {
  func.func @_embedding_net_kernel(%arg0: i32, %arg1: memref<8x4xi32, #tpu.memory_space<vmem>>, %arg2: memref<128x128xf32, #tpu.memory_space<vmem>>, %arg3: memref<8x128xf32, #tpu.memory_space<vmem>>) attributes {dimension_semantics = [#tpu.dimension_semantics<parallel>], iteration_bounds = array<i64: 2>, scalar_prefetch = 0 : i64, scratch_operands = 0 : i64, tpu.core_type = #tpu.core_type<tc>, window_params = [{transform_indices = @transform_0, window_bounds = array<i64: 8, 4>}, {pipeline_mode = #tpu.pipeline_mode<synchronous>, transform_indices = @transform_1, window_bounds = array<i64: 128, 128>}, {transform_indices = @transform_2, window_bounds = array<i64: 8, 128>}]} {
    %c0 = arith.constant 0 : index
    %c0_0 = arith.constant 0 : index
    %0 = vector.load %arg1[%c0, %c0_0] : memref<8x4xi32, #tpu.memory_space<vmem>>, vector<8x4xi32>
    %1 = tpu.iota {dimensions = array<i32: 1>} : vector<8x128xi32>
    %2 = vector.extract_strided_slice %0 {offsets = [0, 0], sizes = [8, 1], strides = [1, 1]} : vector<8x4xi32> to vector<8x1xi32>
    %3 = vector.broadcast %2 : vector<8x1xi32> to vector<8x128xi32>
    %4 = arith.cmpi eq, %1, %3 : vector<8x128xi32>
    %5 = vector.extract_strided_slice %0 {offsets = [0, 1], sizes = [8, 1], strides = [1, 1]} : vector<8x4xi32> to vector<8x1xi32>
    %6 = vector.broadcast %5 : vector<8x1xi32> to vector<8x128xi32>
    %7 = arith.cmpi eq, %1, %6 : vector<8x128xi32>
    %8 = arith.ori %4, %7 : vector<8x128xi1>
    %9 = vector.extract_strided_slice %0 {offsets = [0, 2], sizes = [8, 1], strides = [1, 1]} : vector<8x4xi32> to vector<8x1xi32>
    %10 = vector.broadcast %9 : vector<8x1xi32> to vector<8x128xi32>
    %11 = arith.cmpi eq, %1, %10 : vector<8x128xi32>
    %12 = arith.ori %8, %11 : vector<8x128xi1>
    %13 = vector.extract_strided_slice %0 {offsets = [0, 3], sizes = [8, 1], strides = [1, 1]} : vector<8x4xi32> to vector<8x1xi32>
    %14 = vector.broadcast %13 : vector<8x1xi32> to vector<8x128xi32>
    %15 = arith.cmpi eq, %1, %14 : vector<8x128xi32>
    %16 = arith.ori %12, %15 : vector<8x128xi1>
    %17 = arith.extui %16 : vector<8x128xi1> to vector<8x128xi32>
    %18 = arith.sitofp %17 : vector<8x128xi32> to vector<8x128xf32>
    %c0_1 = arith.constant 0 : index
    %c0_2 = arith.constant 0 : index
    %19 = vector.load %arg2[%c0_1, %c0_2] : memref<128x128xf32, #tpu.memory_space<vmem>>, vector<128x128xf32>
    %cst = arith.constant dense<0.000000e+00> : vector<8x128xf32>
    %20 = tpu.matmul %18, %19, %cst {dimension_numbers = #tpu.dot_dimension_numbers<[1], [0], [0], [1], [0, 0, 1, 1], [], []>} : vector<8x128xf32>, vector<128x128xf32>, vector<8x128xf32> -> vector<8x128xf32>
    %cst_3 = arith.constant dense<0xFF800000> : vector<8xf32>
    %21 = vector.multi_reduction <maximumf>, %20, %cst_3 [1] : vector<8x128xf32> to vector<8xf32>
    %22 = vector.shape_cast %21 : vector<8xf32> to vector<8x1xf32>
    %23 = vector.broadcast %22 : vector<8x1xf32> to vector<8x128xf32>
    %24 = arith.subf %20, %23 : vector<8x128xf32>
    %25 = math.exp %24 : vector<8x128xf32>
    %cst_4 = arith.constant dense<0.000000e+00> : vector<8xf32>
    %26 = vector.multi_reduction <add>, %25, %cst_4 [1] : vector<8x128xf32> to vector<8xf32>
    %27 = vector.shape_cast %26 : vector<8xf32> to vector<8x1xf32>
    %28 = tpu.reciprocal %27 {approx = true} : vector<8x1xf32> -> vector<8x1xf32>
    %29 = vector.broadcast %28 : vector<8x1xf32> to vector<8x128xf32>
    %30 = arith.mulf %25, %29 : vector<8x128xf32>
    %c0_5 = arith.constant 0 : index
    %c0_6 = arith.constant 0 : index
    %31 = vector.load %arg3[%c0_5, %c0_6] : memref<8x128xf32, #tpu.memory_space<vmem>>, vector<8x128xf32>
    tpu.vector_store %arg3[%c0_5, %c0_6], %30 {strides = array<i32>} : memref<8x128xf32, #tpu.memory_space<vmem>>, vector<8x128xf32>,
    return
  }
  func.func @transform_0(%arg0: i32) -> (i32, i32) {
    %c0_i32 = arith.constant 0 : i32
    %c0_i32_0 = arith.constant 0 : i32
    return %arg0, %c0_i32 : i32, i32
  }
  func.func @transform_1(%arg0: i32) -> (i32, i32) {
    %c0_i32 = arith.constant 0 : i32
    %c0_i32_0 = arith.constant 0 : i32
    %c0_i32_1 = arith.constant 0 : i32
    return %c0_i32, %c0_i32_0 : i32, i32
  }
  func.func @transform_2(%arg0: i32) -> (i32, i32) {
    %c0_i32 = arith.constant 0 : i32
    %c0_i32_0 = arith.constant 0 : i32
    return %arg0, %c0_i32 : i32, i32
  }
}

</mosaic_0001>

<bundles_post_ra>
// kernel: tpu_custom_call.1
= control target key start
LH: loop header
LB: loop body
LE: loop exit
PB: predicated region body
PF: predicated region fallthrough
CT: control target
= control target key end

     0   :  { %7 = vsyncpa [#allocation3], 0  ;;  %s776_s0 = inlined_call_operand.vmem [shape: s32[16,4], index: 0, kind: input, shape index: {}]   ;;  %s777_s1 = inlined_call_operand.hbm [shape: f32[128,128], index: 1, kind: input, shape index: {}]   ;;  %s778_s2 = inlined_call_operand.hbm [shape: f32[16,128], index: 2, kind: output, shape index: {}]  }
   0x1   :  { %8 = vsyncpa [#allocation4], 0 }
   0x2   :  { %10 = vsyncpa [#allocation4 + $0x1], 0  ;;  %s641_s9 = smov 0   ;;  %s643_s10 = smov 0  }
   0x3   :  { %s645_s11 = smov 0   ;;  %s647_s12 = smov 0  }
   0x4 LB: > { %s662_s13 = sadd.s32 4294967295, %s612_s12   ;;  %s359_s14 = sadd.s32 4294967294, %s612_s12   ;;  %s612_s12 = sphi %s647_s12, %s794_s12   ;;  %s608_s11 = sphi %s645_s11, %s793_s11   ;;  %s604_s10 = sphi %s643_s10, %s792_s10   ;;  %s600_s9 = sphi %s641_s9, %s791_s9  }
   0x5   : > { %s666_s15 = sadd.s32 1, %s612_s12   ;;  %s70_s16 = sadd.s32 1, %s608_s11 }
   0x6   : > { %s67_s17 = ssub.s32 %s612_s12, %s666_s15  ;;  %p80_p0 = scmp.ne.s32.totalorder %s608_s11, %s604_s10 }
   0x7   : > { %p68_p1 = scmp.eq.s32.totalorder %s67_s17, 0  ;;  %p81_p2 = scmp.eq.s32.totalorder %s662_s13, 1 }
   0x8   : > { %p86_p3 = scmp.ne.s32.totalorder %s604_s10, %s600_s9  ;;  %p87_p4 = scmp.eq.s32.totalorder %s359_s14, 1 }
   0x9   : > { %s677_s18 = scalar_select %p68_p1, %s608_s11, %s70_s16  }
   0xa   : > { %p679_p5 = por %p81_p2, %p80_p0  ;;  %p683_p6 = por %p87_p4, %p86_p3 }
   0xb   : > { %p360_p7 = scmp.ge.s32.totalorder %s612_s12, 1  ;;  %p94_p8 = scmp.lt.s32.totalorder %s612_s12, 3 }
   0xc   : > { %s782_s19 = scalar_select %p679_p5, 1, 0 }
   0xd   : > { %s783_s20 = scalar_select %p683_p6, 1, 0 }
   0xe   : > { %p779_p9 = scmp.eq.s32.totalorder %s662_s13, 0  ;;  %p690_p10 = pnand %p360_p7, %p94_p8 }
   0xf   : > { %s614_s22 = smov [#allocation2]   ;;  %s518_s27 = scalar_lea.hbm %s777_s1, 2048 }
  0x10   : > { %s784_s21 = scalar_select %p690_p10, 1, 0 }
  0x11   : > { %s106_s23 = sshll.u32 %s614_s22, 4  ;;  %p455_p11 = pneg %p690_p10  ;;  %s107_s23 = int_to_ptr.vmem [resolvable:$true] %s106_s23 }
  0x12   : > { %p519_p13 = scmp.ne.s32.totalorder %s777_s1, %s518_s27  ;;  %p525_p3 = scmp.lt.u32.totalorder %s518_s27, %s777_s1 }
  0x13   : > { %p698_p12 = pnand %p779_p9, %p455_p11 }
  0x15   : > { %p520_p0 = pneg %p698_p12 }
  0x17   : > { %p521_p1 = pnand %p520_p0, %p519_p13 }
  0x19   : > { %p522_p2 = pneg %p521_p1 }
  0x1b   : > { %p527_p4 = pnand %p525_p3, %p522_p2 }
  0x1d   : > { %530 = shalt.err (!%p527_p4)
}
  0x1e   : > { %s531_s4 = scalar_lea.vmem %s107_s23, 2048  ;;  %p539_p9 = scmp.lt.s32.totalorder %s107_s23, %s107_s23 }
  0x1f   : > { %p532_p7 = scmp.ne.s32.totalorder %s107_s23, %s531_s4  ;;  %p540_p6 = scmp.lt.s32.totalorder %s531_s4, %s531_s4 }
  0x21   : > { %p534_p8 = pnand %p532_p7, %p520_p0  ;;  %p541_p5 = por %p540_p6, %p539_p9 }
  0x23   : > { %p535_p11 = pneg %p534_p8 }
  0x25   : > { %p542_p10 = pnand %p541_p5, %p535_p11 }
  0x27   : > { %545 = shalt.err (!%p542_p10)
}
  0x28   : > { %s615_s5 = smov 128   ;;  %s616_s6 = smov 8  }
  0x29   : > { %458 = dma.hbm_to_vmem [thread:$0]  (!%p698_p12), %s777_s1, 2048, %s107_s23, [#allocation3], %s615_s5, %s615_s5, %s616_s6  }
  0x2a   : > { %p786_p13 = scmp.ne.s32.totalorder %s784_s21, 0 }
  0x2b   : > { %p787_p1 = scmp.eq.s32.totalorder (!%p786_p13), %s662_s13, 0 }
  0x2c   : > { %129 = sbr.rel (%p786_p13) target bundleno = 734 (0x2de), region = 28 }
  0x33   : > { %591 = dma.done.wait (%p787_p1), [#allocation3], 2048   ;;  %p788_p0 = pmov %p787_p1 }
  0x34   : > { %p150_p5 = scmp.lt.s32.totalorder %s662_s13, 1  ;;  %v617_v0 = vmov 0   ;;  %v618_v1 = vmov 2   ;;  %v619_v2 = vmov 0.0|0.0   ;;  %v178_v4 = vld [vmem:[#allocation2] sm:$0xff]  ;;  %v179_v5 = vld [vmem:[#allocation2 + $0x8] sm:$0xff]  ;;  %v155_v31 = vlaneseq }
  0x35   : > { %593 = vsyncadd (%p788_p0), [#allocation3], 4294965248  ;;  %509 = vset.pattern.permute.xlu0 %v617_v0  ;;  %511 = vset.pattern.permute.xlu1 %v618_v1  ;;  %v426_v6 = vpack.c.bf16 %v179_v5, %v178_v4  ;;  %v180_v7 = vld [vmem:[#allocation2 + $0x10] sm:$0xff]  ;;  %v181_v8 = vld [vmem:[#allocation2 + $0x18] sm:$0xff]  ;;  %v620_v12 = vmov 1   ;;  %v621_v13 = vmov 3  }
  0x36   : > { %s151_s14 = scalar_select %p150_p5, %s662_s13, 1  ;;  %425 = vmatprep.subr.bf16.mxu0 %v619_v2  ;;  %v429_v9 = vpack.c.bf16 %v181_v8, %v180_v7  ;;  %v182_v10 = vld [vmem:[#allocation2 + $0x20] sm:$0xff]  ;;  %v183_v11 = vld [vmem:[#allocation2 + $0x28] sm:$0xff]  ;;  %v184_v15 = vld [vmem:[#allocation2 + $0x30] sm:$0xff]  ;;  %vm622_vm0 = vmmov 0   ;;  %v623_v17 = vmov 0.0  }
  0x37   : > { %427 = vmatpush3.bf16.msra.mxu0 %v426_v6  ;;  %v432_v14 = vpack.c.bf16 %v183_v11, %v182_v10  ;;  %v185_v16 = vld [vmem:[#allocation2 + $0x38] sm:$0xff]  ;;  %422 = vmatprep.mubr.msk.f32.mxu0 %vm622_vm0, %v623_v17  ;;  %v186_v19 = vld [vmem:[#allocation2 + $0x40] sm:$0xff]  ;;  %v187_v20 = vld [vmem:[#allocation2 + $0x48] sm:$0xff]  ;;  %v156_v34 = vand.u32 127, %v155_v31  ;;  %v624_v37 = vmov 1.0   ;;  %s147_s23 = sand.u32 1, %s604_s10  }
  0x38   : > { %s366_s16 = sshll.u32 %s151_s14, 3  ;;  %428 = vmatprep.subr.bf16.mxu0 %v619_v2  ;;  %v435_v18 = vpack.c.bf16 %v185_v16, %v184_v15  ;;  %v438_v21 = vpack.c.bf16 %v187_v20, %v186_v19  ;;  %v188_v22 = vld [vmem:[#allocation2 + $0x50] sm:$0xff]  ;;  %v189_v23 = vld [vmem:[#allocation2 + $0x58] sm:$0xff]  ;;  %v190_v25 = vld [vmem:[#allocation2 + $0x60] sm:$0xff]  ;;  %s365_s24 = sshll.u32 %s147_s23, 3 }
  0x39   : > { %s153_s22 = scalar_lea.vmem %s776_s0, %s366_s16  ;;  %v441_v24 = vpack.c.bf16 %v189_v23, %v188_v22  ;;  %v191_v26 = vld [vmem:[#allocation2 + $0x68] sm:$0xff]  ;;  %v192_v28 = vld [vmem:[#allocation2 + $0x70] sm:$0xff]  ;;  %v193_v29 = vld [vmem:[#allocation2 + $0x78] sm:$0xff]  ;;  %s370_s25 = sshll.u32 %s662_s13, 7 }
  0x3a   : > { %v154_v3 = vld [vmem:[%s153_s22] sm:$0xff]  ;;  %v444_v27 = vpack.c.bf16 %v191_v26, %v190_v25  ;;  %v447_v30 = vpack.c.bf16 %v193_v29, %v192_v28  ;;  %s149_s26 = scalar_lea.vmem [#allocation5], %s365_s24  ;;  %s734_s30 = scalar_lea.hbm %s778_s2, %s370_s25 }
  0x3b   : > { %158 = vperm.xlu0 %509, %v154_v3   ;;  %167 = vperm.xlu1 %511, %v154_v3   ;;  %s288_s27 = sshll.u32 %s149_s26, 4  ;;  %s275_s3 = scalar_lea.sflag [#allocation4], %s147_s23  ;;  %s736_s27 = int_to_ptr.vmem [resolvable:$true] %s288_s27 }
  0x3c   : > { %430 = vmatpush3.bf16.msra.mxu0 %v429_v9  ;;  %s546_s4 = scalar_lea.vmem %s736_s27, 128  ;;  %p789_p9 = scmp.ne.s32.totalorder %s782_s19, 0 }
  0x3d   : > { %431 = vmatprep.subr.bf16.mxu0 %v619_v2  ;;  %p547_p6 = scmp.ne.s32.totalorder %s736_s27, %s546_s4  ;;  %s625_s13 = smov [#allocation5]  }
  0x3e   : > { %s550_s5 = sshll.u32 %s625_s13, 4  ;;  %s551_s5 = int_to_ptr.vmem [resolvable:$false] %s550_s5 }
  0x3f   : > { %510 = vset.pattern.permute.xlu0 %v620_v12  ;;  %512 = vset.pattern.permute.xlu1 %v621_v13  ;;  %p548_p10 = pnand %p547_p6, %p789_p9  ;;  %s552_s6 = scalar_lea.vmem %s551_s5, 256 }
  0x40   : > { %162 = vperm.xlu0 %510, %v154_v3   ;;  %172 = vperm.xlu1 %512, %v154_v3   ;;  %p553_p2 = scmp.lt.s32.totalorder %s736_s27, %s551_s5  ;;  %p554_p3 = scmp.lt.s32.totalorder %s552_s6, %s546_s4 }
  0x41   : > { %433 = vmatpush3.bf16.msra.mxu0 %v432_v14  ;;  %p549_p12 = pneg %p548_p10 }
  0x42   : > { %434 = vmatprep.subr.bf16.mxu0 %v619_v2  ;;  %p555_p4 = por %p554_p3, %p553_p2 }
  0x44   : > { %513 = vset.pattern.permute.xlu0 %v621_v13  ;;  %p556_p7 = pnand %p555_p4, %p549_p12 }
  0x45   : > { %436 = vmatpush3.bf16.msra.mxu0 %v435_v18 }
  0x46   : > { %437 = vmatprep.subr.bf16.mxu0 %v619_v2 }
  0x49   : > { %439 = vmatpush3.bf16.msra.mxu0 %v438_v21 }
  0x4a   : > { %440 = vmatprep.subr.bf16.mxu0 %v619_v2 }
  0x4d   : > { %442 = vmatpush3.bf16.msra.mxu0 %v441_v24 }
  0x4e   : > { %443 = vmatprep.subr.bf16.mxu0 %v619_v2 }
  0x51   : > { %445 = vmatpush3.bf16.msra.mxu0 %v444_v27 }
  0x52   : > { %446 = vmatprep.subr.bf16.mxu0 %v619_v2 }
  0x55   : > { %448 = vmatpush3.bf16.msra.mxu0 %v447_v30 }
  0xba   : > { %v159_v32 = vpop.permute.xlu0 %158  ;;  %v168_v33 = vpop.permute.xlu1 %167 }
  0xbb   : > { %vm160_vm1 = vcmp.eq.s32.totalorder %v156_v34, %v159_v32  ;;  %vm169_vm4 = vcmp.eq.s32.totalorder %v156_v34, %v168_v33 }
  0xbf   : > { %v163_v35 = vpop.permute.xlu0 %162  ;;  %v173_v36 = vpop.permute.xlu1 %172 }
  0xc0   : > { %vm164_vm2 = vcmp.eq.s32.totalorder %v156_v34, %v163_v35  ;;  %vm174_vm3 = vcmp.eq.s32.totalorder %v156_v34, %v173_v36 }
  0xc1   : > { %vm165_vm5 = vmor %vm160_vm1, %vm164_vm2 }
  0xc2   : > { %vm170_vm6 = vmor %vm165_vm5, %vm169_vm4 }
  0xc3   : > { %vm175_vm7 = vmor %vm170_vm6, %vm174_vm3 }
  0xc4   : > { %423 = vmatmul.mubr.msk.f32.vlgmr.msra.gmra.mrb[0].mxu0 %vm175_vm7, %v624_v37 }
 0x197   : > { %v260_v38 = vpop.f32.mrb[0].mxu0 }
 0x198   : > { %264 = vmax.xlane.f32.xlu1 %v260_v38  ;;  %v424_v39 = vpop.f32.mrb[1].mxu0 }
 0x225   : > { %v265_v40 = vpop.xlane.xlu1 %264 }
 0x226   : > { %v266_v41 = vsub.f32 %v260_v38, %v265_v40 }
 0x228   : > { %v267_v42 = vmul.f32 1.442695, %v266_v41 }
 0x22a   : > { %514 = vpow2.f32 %v267_v42 }
 0x234   : > { %v515_v43 = vpop.eup %514 }
 0x235   : > { %269 = vadd.xlane.f32.xlu0 %v515_v43 }
 0x2c2   : > { %v270_v44 = vpop.xlane.xlu0 %269 }
 0x2c3   : > { %516 = vrcp.f32 %v270_v44 }
 0x2cd   : > { %v517_v45 = vpop.eup %516 }
 0x2ce   : > { %v272_v46 = vmul.f32 %v517_v45, %v515_v43 }
 0x2d0   : > { %273 = vst [vmem:[%s149_s26] sm:$0xff] %v272_v46 }
 0x2d1   : > { %559 = shalt.err (!%p556_p7)
}
 0x2d2   : > { %s560_s7 = scalar_lea.hbm %s734_s30, 128  ;;  %s564_s16 = scalar_lea.hbm %s778_s2, 256 }
 0x2d3   : > { %p561_p8 = scmp.ne.s32.totalorder %s734_s30, %s560_s7  ;;  %p565_p1 = scmp.lt.u32.totalorder %s734_s30, %s778_s2 }
 0x2d4   : > { %p566_p0 = scmp.lt.u32.totalorder %s564_s16, %s560_s7  ;;  %p568_p6 = scmp.lt.u32.totalorder %s560_s7, %s734_s30 }
 0x2d5   : > { %p562_p11 = pnand %p561_p8, %p789_p9 }
 0x2d6   : > { %p567_p5 = por %p566_p0, %p565_p1 }
 0x2d7   : > { %p563_p13 = pneg %p562_p11 }
 0x2d8   : > { %p569_p10 = por %p568_p6, %p567_p5 }
 0x2da   : > { %p570_p12 = pnand %p569_p10, %p563_p13 }
 0x2dc   : > { %573 = shalt.err (!%p570_p12)
}
 0x2dd   : > { %453 = dma.vmem_to_hbm [thread:$0]  (%p789_p9), %s736_s27, 128, %s734_s30, %s275_s3  }
 0x2de PF: > { %p465_p2 = scmp.ge.s32.totalorder %s612_s12, 2  ;;  %s300_s22 = sand.u32 1, %s600_s9  }
 0x2df   : > { %p790_p3 = scmp.ne.s32.totalorder %s783_s20, 0  ;;  %s301_s23 = scalar_lea.sflag [#allocation4], %s300_s22 }
 0x2e1   : > { %p460_p4 = pnand %p465_p2, %p790_p3 }
 0x2e3   : > { %595 = dma.done.wait (!%p460_p4), %s301_s23, 128  }
 0x2e4   : > { %597 = vsyncadd (!%p460_p4), %s301_s23, 4294967168  ;;  %p13_p7 = scmp.ge.s32.totalorder %s666_s15, 4   ;;  %s791_s9 = smov %s604_s10 }
 0x2e5   : > { %s792_s10 = smov %s608_s11  ;;  %s793_s11 = smov %s677_s18 }
 0x2e6   : > { %s794_s12 = smov %s666_s15  ;;  %15 = sbr.rel (!%p13_p7) target bundleno = 4 (0x4), region = 68 }
 0x2ed   :  { %306 = vsyncpa [#allocation3], 1 }
 0x2ee   :  { %308 = vsyncpa [#allocation3 + $0x1], 1 }
 0x2ef   :  { %309 = vsyncpa [#allocation4], 1 }
 0x2f0   :  { %311 = vsyncpa [#allocation4 + $0x1], 1 }

</bundles_post_ra>
